<compile_context>
chip_gen: v6e
topology: v6e:2x2x1
jax: 0.10.0
libtpu: 0.0.40
codegen_flags: <defaults>
</compile_context>

<pallas_src>
import jax
import jax.numpy as jnp
from jax.experimental import pallas as pl
from jax.experimental.pallas import tpu as pltpu


def _round_up(n, m):
    return ((n + m - 1) // m) * m


def film_kernel(x_ref, y_ref, w1g_ref, b1g_ref, w1b_ref, b1b_ref,
                w2_ref, b2_ref, out_ref):
    x = x_ref[...]                                  # (TB, D_in)
    y = y_ref[...].astype(jnp.float32)              # (TB, D)

    # fc, pre-split into gamma / beta halves (two MXU dots, f32 accumulate).
    gamma = jnp.dot(x, w1g_ref[...], preferred_element_type=jnp.float32) + b1g_ref[...]
    beta = jnp.dot(x, w1b_ref[...], preferred_element_type=jnp.float32) + b1b_ref[...]

    # FiLM modulation in f32 on the VPU.
    filmed = gamma * y + beta                       # (TB, D)

    # fc_out into a lane-dense padded output tile.
    out = jnp.dot(filmed.astype(w2_ref.dtype), w2_ref[...],
                  preferred_element_type=jnp.float32) + b2_ref[...]
    out_ref[...] = out.astype(out_ref.dtype)


def film_forward(x, y, w1, b1, w2, b2, *, x_film=True, block_b=256, mxu_dtype=None):
    """Pallas-backed FiLM forward. Returns (x, y, output) exactly like the torch module.

    w1: (D_in, 2*D), b1: (1, 2*D), w2: (D, D_out), b2: (1, D_out).
    block_b: batch tile (rounded to a multiple of 8).
    mxu_dtype: optional narrow dtype (e.g. jnp.bfloat16) for MXU inputs on v6e/v7x;
               accumulation stays f32.
    """
    film = x if x_film else y
    to_be_film = y if x_film else x

    B, D_in = film.shape
    D = to_be_film.shape[1]
    D_out = w2.shape[1]
    assert w1.shape == (D_in, 2 * D)
    assert b1.shape == (1, 2 * D)
    assert w2.shape == (D, D_out)
    assert b2.shape == (1, D_out)

    # --- wrapper-side layout plumbing (zero-cost, outside the hot loop) -------
    # Pre-split fc weights so the kernel never slices a (B, 2D) value at column D.
    w1g, w1b = w1[:, :D], w1[:, D:]
    b1g, b1b = b1[:, :D], b1[:, D:]

    # Lane-dense output: pad D_out up to a multiple of 128 with zero columns.
    d_out_pad = _round_up(max(D_out, 128), 128)
    w2p = jnp.zeros((D, d_out_pad), w2.dtype).at[:, :D_out].set(w2)
    b2p = jnp.zeros((1, d_out_pad), b2.dtype).at[:, :D_out].set(b2)

    # Optional narrow MXU inputs (v6e/v7x); biases stay f32 (added post-accumulate).
    if mxu_dtype is not None:
        film = film.astype(mxu_dtype)
        w1g, w1b, w2p = (w1g.astype(mxu_dtype), w1b.astype(mxu_dtype),
                         w2p.astype(mxu_dtype))

    # Batch tiling: TB multiple of 8 (f32 sublanes); pad B so the grid divides evenly.
    tb = max(8, _round_up(min(block_b, _round_up(B, 8)), 8))
    b_pad = _round_up(B, tb)
    if b_pad != B:
        film_p = jnp.zeros((b_pad, D_in), film.dtype).at[:B].set(film)
        tbf_p = jnp.zeros((b_pad, D), to_be_film.dtype).at[:B].set(to_be_film)
    else:
        film_p, tbf_p = film, to_be_film

    grid = (b_pad // tb,)

    out_padded = pl.pallas_call(
        film_kernel,
        out_shape=jax.ShapeDtypeStruct((b_pad, d_out_pad), jnp.float32),
        grid=grid,
        in_specs=[
            pl.BlockSpec((tb, D_in), lambda i: (i, 0)),       # x tile marches over batch
            pl.BlockSpec((tb, D), lambda i: (i, 0)),          # y tile marches over batch
            pl.BlockSpec((D_in, D), lambda i: (0, 0)),        # W1_gamma, VMEM-resident
            pl.BlockSpec((1, D), lambda i: (0, 0)),           # b1_gamma
            pl.BlockSpec((D_in, D), lambda i: (0, 0)),        # W1_beta
            pl.BlockSpec((1, D), lambda i: (0, 0)),           # b1_beta
            pl.BlockSpec((D, d_out_pad), lambda i: (0, 0)),   # W2 (padded), resident
            pl.BlockSpec((1, d_out_pad), lambda i: (0, 0)),   # b2 (padded)
        ],
        out_specs=pl.BlockSpec((tb, d_out_pad), lambda i: (i, 0)),
        compiler_params=pltpu.CompilerParams(
            dimension_semantics=("parallel",)),               # megacore on v7x
    )(film_p, tbf_p, w1g, b1g, w1b, b1b, w2p, b2p)

    # TODO(synk): for very large D_in*2D weights (beyond v7x's 64 MiB VMEM) add a
    # K-reduction grid axis with an accumulator scratch instead of resident weights.
    out = out_padded[:B, :D_out]
    return x, y, out


if __name__ == "__main__":
    # Small shapes consistent with the module (input_dim = dim, output_dim = 2).
    B, D_IN, D, D_OUT = 16, 128, 128, 2

    key = jax.random.PRNGKey(0)
    kx, ky, kw1, kb1, kw2, kb2 = jax.random.split(key, 6)

    x = jax.random.normal(kx, (B, D_IN), dtype=jnp.float32)
    y = jax.random.normal(ky, (B, D), dtype=jnp.float32)

    # Deterministic synthetic parameters (shapes mirror nn.Linear in __init__).
    w1 = jax.random.normal(kw1, (D_IN, 2 * D), dtype=jnp.float32) * 0.05
    b1 = jax.random.normal(kb1, (1, 2 * D), dtype=jnp.float32) * 0.05
    w2 = jax.random.normal(kw2, (D, D_OUT), dtype=jnp.float32) * 0.05
    b2 = jax.random.normal(kb2, (1, D_OUT), dtype=jnp.float32) * 0.05

    # block_b=8 -> grid=(2,) so batch tiling / pipelining is actually exercised.
    x_out, y_out, out = film_forward(x, y, w1, b1, w2, b2, x_film=True, block_b=8)
    jax.block_until_ready(out)

    # Pure-JAX reference check of the hot path.
    gb = x @ w1 + b1
    gamma, beta = gb[:, :D], gb[:, D:]
    ref = (gamma * y + beta) @ w2 + b2
    assert out.shape == (B, D_OUT)
    assert jnp.allclose(out, ref, atol=1e-5, rtol=1e-5), "mismatch vs reference"

    # Passthrough outputs are returned untouched, like the torch module.
    assert x_out is x and y_out is y

    print("KERNEL_OK")
</pallas_src>

<mosaic_0001>
module attributes {stable_mosaic.version = 11 : i64} {
  func.func @film_kernel(%arg0: i32, %arg1: memref<8x128xf32, #tpu.memory_space<vmem>>, %arg2: memref<8x128xf32, #tpu.memory_space<vmem>>, %arg3: memref<128x128xf32, #tpu.memory_space<vmem>>, %arg4: memref<1x128xf32, #tpu.memory_space<vmem>>, %arg5: memref<128x128xf32, #tpu.memory_space<vmem>>, %arg6: memref<1x128xf32, #tpu.memory_space<vmem>>, %arg7: memref<128x128xf32, #tpu.memory_space<vmem>>, %arg8: memref<1x128xf32, #tpu.memory_space<vmem>>, %arg9: memref<8x128xf32, #tpu.memory_space<vmem>>) attributes {dimension_semantics = [#tpu.dimension_semantics<parallel>], iteration_bounds = array<i64: 2>, scalar_prefetch = 0 : i64, scratch_operands = 0 : i64, tpu.core_type = #tpu.core_type<tc>, window_params = [{transform_indices = @transform_0, window_bounds = array<i64: 8, 128>}, {transform_indices = @transform_1, window_bounds = array<i64: 8, 128>}, {pipeline_mode = #tpu.pipeline_mode<synchronous>, transform_indices = @transform_2, window_bounds = array<i64: 128, 128>}, {pipeline_mode = #tpu.pipeline_mode<synchronous>, transform_indices = @transform_3, window_bounds = array<i64: 1, 128>}, {pipeline_mode = #tpu.pipeline_mode<synchronous>, transform_indices = @transform_4, window_bounds = array<i64: 128, 128>}, {pipeline_mode = #tpu.pipeline_mode<synchronous>, transform_indices = @transform_5, window_bounds = array<i64: 1, 128>}, {pipeline_mode = #tpu.pipeline_mode<synchronous>, transform_indices = @transform_6, window_bounds = array<i64: 128, 128>}, {pipeline_mode = #tpu.pipeline_mode<synchronous>, transform_indices = @transform_7, window_bounds = array<i64: 1, 128>}, {transform_indices = @transform_8, window_bounds = array<i64: 8, 128>}]} {
    %c0 = arith.constant 0 : index
    %c0_0 = arith.constant 0 : index
    %0 = vector.load %arg1[%c0, %c0_0] : memref<8x128xf32, #tpu.memory_space<vmem>>, vector<8x128xf32>
    %c0_1 = arith.constant 0 : index
    %c0_2 = arith.constant 0 : index
    %1 = vector.load %arg2[%c0_1, %c0_2] : memref<8x128xf32, #tpu.memory_space<vmem>>, vector<8x128xf32>
    %c0_3 = arith.constant 0 : index
    %c0_4 = arith.constant 0 : index
    %2 = vector.load %arg3[%c0_3, %c0_4] : memref<128x128xf32, #tpu.memory_space<vmem>>, vector<128x128xf32>
    %cst = arith.constant dense<0.000000e+00> : vector<8x128xf32>
    %3 = tpu.matmul %0, %2, %cst {dimension_numbers = #tpu.dot_dimension_numbers<[1], [0], [0], [1], [0, 0, 1, 1], [], []>} : vector<8x128xf32>, vector<128x128xf32>, vector<8x128xf32> -> vector<8x128xf32>
    %c0_5 = arith.constant 0 : index
    %c0_6 = arith.constant 0 : index
    %4 = vector.load %arg4[%c0_5, %c0_6] : memref<1x128xf32, #tpu.memory_space<vmem>>, vector<1x128xf32>
    %5 = vector.broadcast %4 : vector<1x128xf32> to vector<8x128xf32>
    %6 = arith.addf %3, %5 : vector<8x128xf32>
    %c0_7 = arith.constant 0 : index
    %c0_8 = arith.constant 0 : index
    %7 = vector.load %arg5[%c0_7, %c0_8] : memref<128x128xf32, #tpu.memory_space<vmem>>, vector<128x128xf32>
    %cst_9 = arith.constant dense<0.000000e+00> : vector<8x128xf32>
    %8 = tpu.matmul %0, %7, %cst_9 {dimension_numbers = #tpu.dot_dimension_numbers<[1], [0], [0], [1], [0, 0, 1, 1], [], []>} : vector<8x128xf32>, vector<128x128xf32>, vector<8x128xf32> -> vector<8x128xf32>
    %c0_10 = arith.constant 0 : index
    %c0_11 = arith.constant 0 : index
    %9 = vector.load %arg6[%c0_10, %c0_11] : memref<1x128xf32, #tpu.memory_space<vmem>>, vector<1x128xf32>
    %10 = vector.broadcast %9 : vector<1x128xf32> to vector<8x128xf32>
    %11 = arith.addf %8, %10 : vector<8x128xf32>
    %12 = arith.mulf %6, %1 : vector<8x128xf32>
    %13 = arith.addf %12, %11 : vector<8x128xf32>
    %c0_12 = arith.constant 0 : index
    %c0_13 = arith.constant 0 : index
    %14 = vector.load %arg7[%c0_12, %c0_13] : memref<128x128xf32, #tpu.memory_space<vmem>>, vector<128x128xf32>
    %cst_14 = arith.constant dense<0.000000e+00> : vector<8x128xf32>
    %15 = tpu.matmul %13, %14, %cst_14 {dimension_numbers = #tpu.dot_dimension_numbers<[1], [0], [0], [1], [0, 0, 1, 1], [], []>} : vector<8x128xf32>, vector<128x128xf32>, vector<8x128xf32> -> vector<8x128xf32>
    %c0_15 = arith.constant 0 : index
    %c0_16 = arith.constant 0 : index
    %16 = vector.load %arg8[%c0_15, %c0_16] : memref<1x128xf32, #tpu.memory_space<vmem>>, vector<1x128xf32>
    %17 = vector.broadcast %16 : vector<1x128xf32> to vector<8x128xf32>
    %18 = arith.addf %15, %17 : vector<8x128xf32>
    %c0_17 = arith.constant 0 : index
    %c0_18 = arith.constant 0 : index
    %19 = vector.load %arg9[%c0_17, %c0_18] : memref<8x128xf32, #tpu.memory_space<vmem>>, vector<8x128xf32>
    tpu.vector_store %arg9[%c0_17, %c0_18], %18 {strides = array<i32>} : memref<8x128xf32, #tpu.memory_space<vmem>>, vector<8x128xf32>,
    return
  }
  func.func @transform_0(%arg0: i32) -> (i32, i32) {
    %c0_i32 = arith.constant 0 : i32
    %c0_i32_0 = arith.constant 0 : i32
    return %arg0, %c0_i32 : i32, i32
  }
  func.func @transform_1(%arg0: i32) -> (i32, i32) {
    %c0_i32 = arith.constant 0 : i32
    %c0_i32_0 = arith.constant 0 : i32
    return %arg0, %c0_i32 : i32, i32
  }
  func.func @transform_2(%arg0: i32) -> (i32, i32) {
    %c0_i32 = arith.constant 0 : i32
    %c0_i32_0 = arith.constant 0 : i32
    %c0_i32_1 = arith.constant 0 : i32
    return %c0_i32, %c0_i32_0 : i32, i32
  }
  func.func @transform_3(%arg0: i32) -> (i32, i32) {
    %c0_i32 = arith.constant 0 : i32
    %c0_i32_0 = arith.constant 0 : i32
    %c0_i32_1 = arith.constant 0 : i32
    return %c0_i32, %c0_i32_0 : i32, i32
  }
  func.func @transform_4(%arg0: i32) -> (i32, i32) {
    %c0_i32 = arith.constant 0 : i32
    %c0_i32_0 = arith.constant 0 : i32
    %c0_i32_1 = arith.constant 0 : i32
    return %c0_i32, %c0_i32_0 : i32, i32
  }
  func.func @transform_5(%arg0: i32) -> (i32, i32) {
    %c0_i32 = arith.constant 0 : i32
    %c0_i32_0 = arith.constant 0 : i32
    %c0_i32_1 = arith.constant 0 : i32
    return %c0_i32, %c0_i32_0 : i32, i32
  }
  func.func @transform_6(%arg0: i32) -> (i32, i32) {
    %c0_i32 = arith.constant 0 : i32
    %c0_i32_0 = arith.constant 0 : i32
    %c0_i32_1 = arith.constant 0 : i32
    return %c0_i32, %c0_i32_0 : i32, i32
  }
  func.func @transform_7(%arg0: i32) -> (i32, i32) {
    %c0_i32 = arith.constant 0 : i32
    %c0_i32_0 = arith.constant 0 : i32
    %c0_i32_1 = arith.constant 0 : i32
    return %c0_i32, %c0_i32_0 : i32, i32
  }
  func.func @transform_8(%arg0: i32) -> (i32, i32) {
    %c0_i32 = arith.constant 0 : i32
    %c0_i32_0 = arith.constant 0 : i32
    return %arg0, %c0_i32 : i32, i32
  }
}

</mosaic_0001>

<bundles_post_ra>
// kernel: tpu_custom_call.1
= control target key start
LH: loop header
LB: loop body
LE: loop exit
PB: predicated region body
PF: predicated region fallthrough
CT: control target
= control target key end

     0   :  { %s1647_s0 = inlined_call_operand.hbm [shape: f32[16,128], index: 0, kind: input, shape index: {}]   ;;  %s1648_s1 = inlined_call_operand.hbm [shape: f32[16,128], index: 1, kind: input, shape index: {}]   ;;  %s1649_s2 = inlined_call_operand.hbm [shape: f32[128,128], index: 2, kind: input, shape index: {}]   ;;  %s1650_s3 = inlined_call_operand.vmem [shape: f32[1,128], index: 3, kind: input, shape index: {}]   ;;  %s1651_s4 = inlined_call_operand.hbm [shape: f32[128,128], index: 4, kind: input, shape index: {}]   ;;  %s1652_s5 = inlined_call_operand.vmem [shape: f32[1,128], index: 5, kind: input, shape index: {}]   ;;  %s1653_s6 = inlined_call_operand.hbm [shape: f32[128,128], index: 6, kind: input, shape index: {}]   ;;  %s1654_s7 = inlined_call_operand.vmem [shape: f32[1,128], index: 7, kind: input, shape index: {}]   ;;  %s1655_s8 = inlined_call_operand.hbm [shape: f32[16,128], index: 8, kind: output, shape index: {}]  }
   0x1   :  { %1661 = sst [smem:[#allocation19_spill]] %s1649_s2 }
   0x2   :  { %1662 = sst [smem:[#allocation20_spill]] %s1651_s4 }
   0x3   :  { %1663 = sst [smem:[#allocation21_spill]] %s1653_s6 }
   0x4   :  { %13 = vsyncpa [#allocation3], 0 }
   0x5   :  { %15 = vsyncpa [#allocation3 + $0x1], 0 }
   0x6   :  { %16 = vsyncpa [#allocation6], 0 }
   0x7   :  { %18 = vsyncpa [#allocation6 + $0x1], 0 }
   0x8   :  { %19 = vsyncpa [#allocation9], 0 }
   0x9   :  { %20 = vsyncpa [#allocation4], 0 }
   0xa   :  { %22 = vsyncpa [#allocation4 + $0x1], 0  ;;  %s1353_s27 = smov 0   ;;  %s1355_s28 = smov 0  }
   0xb   :  { %s1357_s29 = smov 0   ;;  %s1359_s30 = smov 0  }
   0xc LB: > { %1664 = sst [smem:[#allocation17_spill]] %s1292_s29  ;;  %s1374_s9 = sadd.s32 4294967295, %s1296_s30   ;;  %s1296_s30 = sphi %s1359_s30, %s1689_s30   ;;  %s1292_s29 = sphi %s1357_s29, %s1686_s29   ;;  %s1288_s28 = sphi %s1355_s28, %s1688_s28   ;;  %s1284_s27 = sphi %s1353_s27, %s1687_s27  }
   0xd   : > { %s820_s10 = sadd.s32 4294967294, %s1296_s30   ;;  %p48_p0 = scmp.ne.s32.totalorder %s1288_s28, %s1284_s27 }
   0xe   : > { %p1656_p1 = scmp.eq.s32.totalorder %s1374_s9, 0  ;;  %p230_p3 = scmp.eq.s32.totalorder %s820_s10, 1 }
   0xf   : > { %p821_p5 = scmp.ge.s32.totalorder %s1296_s30, 1  ;;  %p237_p7 = scmp.lt.s32.totalorder %s1296_s30, 3 }
  0x10   : > { %p1383_p4 = por %p1656_p1, %p48_p0  ;;  %p1388_p6 = por %p230_p3, %p48_p0 }
  0x11   : > { %p1393_p8 = pnand %p821_p5, %p237_p7  ;;  %s1298_s14 = smov [#allocation7]  }
  0x12   : > { %s1665_s11 = scalar_select %p1383_p4, 1, 0 }
  0x13   : > { %s1666_s12 = scalar_select %p1388_p6, 1, 0 }
  0x14   : > { %s1667_s13 = scalar_select %p1393_p8, 1, 0 }
  0x15   : > { %s249_s15 = sshll.u32 %s1298_s14, 4  ;;  %p1018_p9 = pneg %p1393_p8  ;;  %s250_s15 = int_to_ptr.vmem [resolvable:$true] %s249_s15 }
  0x16   : > { %s1299_s17 = smov [#allocation8]   ;;  %s1300_s19 = smov [#allocation10]  }
  0x17   : > { %p1402_p11 = pnand %p1018_p9, %p1656_p1  ;;  %s265_s18 = sshll.u32 %s1299_s17, 4  ;;  %s266_s18 = int_to_ptr.vmem [resolvable:$true] %s265_s18 }
  0x18   : > { %s281_s20 = sshll.u32 %s1300_s19, 4  ;;  %s1097_s21 = scalar_lea.vmem %s250_s15, 2048  ;;  %s282_s20 = int_to_ptr.vmem [resolvable:$true] %s281_s20 }
  0x19   : > { %p1088_p12 = pneg %p1402_p11  ;;  %p1098_p13 = scmp.ne.s32.totalorder %s250_s15, %s1097_s21 }
  0x1a   : > { %p1105_p5 = scmp.lt.s32.totalorder %s250_s15, %s250_s15  ;;  %p1106_p7 = scmp.lt.s32.totalorder %s1097_s21, %s1097_s21 }
  0x1b   : > { %p1100_p0 = pnand %p1098_p13, %p1088_p12 }
  0x1c   : > { %p1107_p9 = por %p1106_p7, %p1105_p5 }
  0x1d   : > { %p1101_p3 = pneg %p1100_p0 }
  0x1f   : > { %p1108_p10 = pnand %p1107_p9, %p1101_p3 }
  0x21   : > { %1111 = shalt.err (!%p1108_p10)
}
  0x22   : > { %s1301_s22 = smov 128   ;;  %s1302_s23 = smov 8  }
  0x23   : > { %s1669_s2 = sld [smem:[#allocation19_spill]]  ;;  %s1123_s26 = scalar_lea.vmem %s266_s18, 2048 }
  0x24   : > { %p1124_p1 = scmp.ne.s32.totalorder %s266_s18, %s1123_s26  ;;  %p1131_p2 = scmp.lt.s32.totalorder %s266_s18, %s266_s18 }
  0x25   : > { %p1132_p6 = scmp.lt.s32.totalorder %s1123_s26, %s1123_s26 }
  0x26   : > { %p1126_p13 = pnand %p1124_p1, %p1088_p12 }
  0x27   : > { %p1133_p5 = por %p1132_p6, %p1131_p2 }
  0x28   : > { %p1127_p0 = pneg %p1126_p13 }
  0x29   : > { %1021 = dma.hbm_to_vmem [thread:$0]  (!%p1402_p11), %s1669_s2, 2048, %s250_s15, [#allocation6], %s1301_s22, %s1301_s22, %s1302_s23  }
  0x2a   : > { %p1134_p3 = pnand %p1133_p5, %p1127_p0 }
  0x2c   : > { %1137 = shalt.err (!%p1134_p3)
}
  0x2d   : > { %s1670_s4 = sld [smem:[#allocation20_spill]]  ;;  %s1149_s15 = scalar_lea.vmem %s282_s20, 2048 }
  0x2e   : > { %p1150_p10 = scmp.ne.s32.totalorder %s282_s20, %s1149_s15  ;;  %p1157_p9 = scmp.lt.s32.totalorder %s282_s20, %s282_s20 }
  0x2f   : > { %p1158_p13 = scmp.lt.s32.totalorder %s1149_s15, %s1149_s15 }
  0x30   : > { %p1152_p7 = pnand %p1150_p10, %p1088_p12 }
  0x31   : > { %p1159_p4 = por %p1158_p13, %p1157_p9 }
  0x32   : > { %p1153_p1 = pneg %p1152_p7 }
  0x33   : > { %1024 = dma.hbm_to_vmem [thread:$0]  (!%p1402_p11), %s1670_s4, 2048, %s266_s18, [#allocation9], %s1301_s22, %s1301_s22, %s1302_s23  }
  0x34   : > { %p1160_p2 = pnand %p1159_p4, %p1153_p1 }
  0x36   : > { %1163 = shalt.err (!%p1160_p2)
}
  0x37   : > { %s1671_s6 = sld [smem:[#allocation21_spill]]  ;;  %s1433_s18 = sadd.s32 1, %s1296_s30  }
  0x38   : > { %s32_s21 = ssub.s32 %s1296_s30, %s1433_s18  ;;  %s35_s16 = sadd.s32 1, %s1292_s29 }
  0x39   : > { %p33_p4 = scmp.eq.s32.totalorder %s32_s21, 0  ;;  %p42_p6 = scmp.ne.s32.totalorder %s1292_s29, %s1288_s28 }
  0x3a   : > { %p43_p12 = scmp.eq.s32.totalorder %s1296_s30, 0  ;;  %p1042_p0 = scmp.lt.s32.totalorder %s1296_s30, 2 }
  0x3b   : > { %s1443_s24 = scalar_select %p33_p4, %s1292_s29, %s35_s16  }
  0x3c   : > { %p44_p5 = por %p43_p12, %p42_p6  ;;  %p1673_p3 = scmp.eq.s32.totalorder %s1374_s9, 1 }
  0x3d   : > { %1027 = dma.hbm_to_vmem [thread:$0]  (!%p1402_p11), %s1671_s6, 2048, %s282_s20, [#allocation9], %s1301_s22, %s1301_s22, %s1302_s23  }
  0x3e   : > { %1672 = sst [smem:[#allocation18_spill]] %s1443_s24  ;;  %p1447_p10 = por %p1673_p3, %p42_p6 }
  0x3f   : > { %s298_s26 = sand.u32 1, %s1292_s29   ;;  %s827_s10 = sshll.u32 %s1296_s30, 7 }
  0x40   : > { %s1674_s25 = scalar_select %p1447_p10, 1, 0 }
  0x41   : > { %s1453_s20 = sshll.u32 %s298_s26, 3  ;;  %s1458_s14 = scalar_lea.hbm %s1647_s0, %s827_s10 }
  0x42   : > { %s302_s15 = scalar_lea.vmem [#allocation2], %s1453_s20  ;;  %p1461_p11 = pnand %p1042_p0, %p44_p5 }
  0x43   : > { %s309_s17 = sshll.u32 %s302_s15, 4  ;;  %s1468_s2 = scalar_lea.hbm %s1648_s1, %s827_s10  ;;  %s310_s17 = int_to_ptr.vmem [resolvable:$true] %s309_s17 }
  0x44   : > { %s299_s22 = scalar_lea.sflag [#allocation3], %s298_s26  ;;  %s1164_s23 = scalar_lea.hbm %s1458_s14, 128 }
  0x45   : > { %p1165_p7 = scmp.ne.s32.totalorder %s1458_s14, %s1164_s23  ;;  %p1166_p1 = pneg %p1461_p11 }
  0x46   : > { %s1169_s6 = scalar_lea.hbm %s1647_s0, 256  ;;  %p1170_p2 = scmp.lt.s32.totalorder %s1458_s14, %s1647_s0 }
  0x47   : > { %p1167_p9 = pnand %p1166_p1, %p1165_p7  ;;  %p1171_p4 = scmp.lt.s32.totalorder %s1169_s6, %s1164_s23 }
  0x49   : > { %p1168_p13 = pneg %p1167_p9  ;;  %p1172_p6 = por %p1171_p4, %p1170_p2 }
  0x4b   : > { %p1173_p12 = pnand %p1172_p6, %p1168_p13 }
  0x4d   : > { %1176 = shalt.err (!%p1173_p12)
}
  0x4e   : > { %s1177_s26 = scalar_lea.vmem %s310_s17, 128  ;;  %s1303_s10 = smov [#allocation2]  }
  0x4f   : > { %p1178_p0 = scmp.ne.s32.totalorder %s310_s17, %s1177_s26  ;;  %s1182_s21 = sshll.u32 %s1303_s10, 4  ;;  %s1183_s21 = int_to_ptr.vmem [resolvable:$false] %s1182_s21 }
  0x50   : > { %s1184_s4 = scalar_lea.vmem %s1183_s21, 256  ;;  %p1185_p7 = scmp.lt.s32.totalorder %s310_s17, %s1183_s21 }
  0x51   : > { %p1180_p5 = pnand %p1178_p0, %p1166_p1  ;;  %p1186_p9 = scmp.lt.s32.totalorder %s1184_s4, %s1177_s26 }
  0x53   : > { %p1181_p3 = pneg %p1180_p5  ;;  %p1187_p10 = por %p1186_p9, %p1185_p7 }
  0x55   : > { %p1188_p8 = pnand %p1187_p10, %p1181_p3 }
  0x57   : > { %1191 = shalt.err (!%p1188_p8)
}
  0x58   : > { %1031 = dma.hbm_to_vmem [thread:$0]  (!%p1461_p11), %s1458_s14, 128, %s310_s17, %s299_s22  }
  0x59   : > { %s316_s6 = sand.u32 1, %s1296_s30   ;;  %s320_s29 = scalar_lea.vmem [#allocation5], %s1453_s20 }
  0x5a   : > { %s327_s24 = sshll.u32 %s320_s29, 4  ;;  %s317_s16 = scalar_lea.sflag [#allocation6], %s316_s6  ;;  %s328_s24 = int_to_ptr.vmem [resolvable:$true] %s327_s24 }
  0x5b   : > { %s1192_s23 = scalar_lea.hbm %s1468_s2, 128  ;;  %s1197_s10 = scalar_lea.hbm %s1648_s1, 256 }
  0x5c   : > { %p1193_p13 = scmp.ne.s32.totalorder %s1468_s2, %s1192_s23  ;;  %p1198_p2 = scmp.lt.s32.totalorder %s1468_s2, %s1648_s1 }
  0x5d   : > { %p1199_p4 = scmp.lt.s32.totalorder %s1197_s10, %s1192_s23 }
  0x5e   : > { %p1195_p8 = pnand %p1193_p13, %p1166_p1 }
  0x5f   : > { %p1200_p6 = por %p1199_p4, %p1198_p2 }
  0x60   : > { %p1196_p10 = pneg %p1195_p8 }
  0x62   : > { %p1201_p12 = pnand %p1200_p6, %p1196_p10 }
  0x64   : > { %1204 = shalt.err (!%p1201_p12)
}
  0x65   : > { %s1205_s20 = scalar_lea.vmem %s328_s24, 128  ;;  %s1304_s14 = smov [#allocation5]  }
  0x66   : > { %p1206_p0 = scmp.ne.s32.totalorder %s328_s24, %s1205_s20  ;;  %s1210_s17 = sshll.u32 %s1304_s14, 4  ;;  %s1211_s17 = int_to_ptr.vmem [resolvable:$false] %s1210_s17 }
  0x67   : > { %s1212_s22 = scalar_lea.vmem %s1211_s17, 256  ;;  %p1213_p7 = scmp.lt.s32.totalorder %s328_s24, %s1211_s17 }
  0x68   : > { %p1208_p5 = pnand %p1206_p0, %p1166_p1  ;;  %p1214_p9 = scmp.lt.s32.totalorder %s1212_s22, %s1205_s20 }
  0x6a   : > { %p1209_p3 = pneg %p1208_p5  ;;  %p1215_p13 = por %p1214_p9, %p1213_p7 }
  0x6c   : > { %p1216_p8 = pnand %p1215_p13, %p1209_p3 }
  0x6e   : > { %1219 = shalt.err (!%p1216_p8)
}
  0x6f   : > { %1034 = dma.hbm_to_vmem [thread:$0]  (!%p1461_p11), %s1468_s2, 128, %s328_s24, %s317_s16  }
  0x70   : > { %p1676_p10 = scmp.ne.s32.totalorder %s1667_s13, 0 }
  0x71   : > { %s1513_s6 = sand.u32 (!%p1676_p10), 1, %s1288_s28   ;;  %p1677_p1 = scmp.ne.s32.totalorder (!%p1676_p10), %s1665_s11, 0 }
  0x72   : > { %336 = sbr.rel (%p1676_p10) target bundleno = 571 (0x23b), region = 52  ;;  %s1516_s29 = sshll.u32 (!%p1676_p10), %s1513_s6, 3 }
  0x73   : > { %s339_s23 = scalar_lea.sflag (!%p1676_p10), [#allocation3], %s1513_s6  ;;  %s342_s15 = scalar_lea.vmem (!%p1676_p10), [#allocation2], %s1516_s29 }
  0x77   : > { %1263 = dma.done.wait (%p1677_p1), %s339_s23, 128  }
  0x78   : > { %1265 = vsyncadd (%p1677_p1), %s339_s23, 4294967168  ;;  %s347_s2 = sand.u32 1, %s1374_s9   ;;  %s351_s19 = scalar_lea.vmem [#allocation5], %s1516_s29 }
  0x79   : > { %s348_s13 = scalar_lea.sflag [#allocation6], %s347_s2 }
  0x7a   : > { %1267 = dma.done.wait (%p1677_p1), %s348_s13, 128  }
  0x7b   : > { %1269 = vsyncadd (%p1677_p1), %s348_s13, 4294967168  ;;  %p1678_p11 = scmp.eq.s32.totalorder %s1374_s9, 0 }
  0x7d   : > { %1271 = dma.done.wait (%p1678_p11), [#allocation6], 2048   ;;  %p1679_p2 = pmov %p1678_p11 }
  0x7f   : > { %1273 = vsyncadd (%p1679_p2), [#allocation6], 4294965248  ;;  %p1680_p4 = pmov %p1679_p2 }
  0x80   : > { %p1681_p6 = pmov %p1679_p2 }
  0x81   : > { %1275 = dma.done.wait (%p1680_p4), [#allocation9], 4096  }
  0x82   : > { %1277 = vsyncadd (%p1681_p6), [#allocation9], 4294963200  ;;  %v1305_v0 = vmov 0.0   ;;  %vm1306_vm0 = vmmov 0   ;;  %v418_v1 = vld [vmem:[#allocation7 + $0x78] sm:$0xff]  ;;  %v417_v3 = vld [vmem:[#allocation7 + $0x70] sm:$0xff] }
  0x83   : > { %895 = vmatprep.subr.mxu0 %v1305_v0  ;;  %930 = vmatprep.subr.mxu1 %v1305_v0  ;;  %v511_v2 = vld [vmem:[#allocation8 + $0x78] sm:$0xff]  ;;  %v510_v4 = vld [vmem:[#allocation8 + $0x70] sm:$0xff]  ;;  %v416_v5 = vld [vmem:[#allocation7 + $0x68] sm:$0xff]  ;;  %s841_s4 = sshll.u32 %s1374_s9, 7  ;;  %s400_s20 = scalar_lea.vmem [#allocation11], %s1516_s29 }
  0x84   : > { %927 = vmatprep.mubr.msk.f32.mxu0 %vm1306_vm0, %v1305_v0  ;;  %962 = vmatprep.mubr.msk.f32.mxu1 %vm1306_vm0, %v1305_v0  ;;  %v509_v6 = vld [vmem:[#allocation8 + $0x68] sm:$0xff]  ;;  %v415_v7 = vld [vmem:[#allocation7 + $0x60] sm:$0xff]  ;;  %v414_v9 = vld [vmem:[#allocation7 + $0x58] sm:$0xff]  ;;  %s699_s14 = sshll.u32 %s400_s20, 4  ;;  %s1610_s23 = scalar_lea.hbm %s1655_s8, %s841_s4  ;;  %s700_s14 = int_to_ptr.vmem [resolvable:$true] %s699_s14 }
  0x85   : > { %896 = vmatpush3.msra.mxu0 %v418_v1  ;;  %931 = vmatpush3.msra.mxu1 %v511_v2  ;;  %v508_v8 = vld [vmem:[#allocation8 + $0x60] sm:$0xff]  ;;  %v507_v10 = vld [vmem:[#allocation8 + $0x58] sm:$0xff]  ;;  %v413_v11 = vld [vmem:[#allocation7 + $0x50] sm:$0xff]  ;;  %s1220_s2 = scalar_lea.vmem %s700_s14, 128  ;;  %p1682_p0 = scmp.ne.s32.totalorder %s1674_s25, 0 }
  0x86   : > { %897 = vmatprep.subr.mxu0 %v1305_v0  ;;  %932 = vmatprep.subr.mxu1 %v1305_v0  ;;  %v506_v12 = vld [vmem:[#allocation8 + $0x50] sm:$0xff]  ;;  %v412_v13 = vld [vmem:[#allocation7 + $0x48] sm:$0xff]  ;;  %v411_v15 = vld [vmem:[#allocation7 + $0x40] sm:$0xff]  ;;  %p1221_p12 = scmp.ne.s32.totalorder %s700_s14, %s1220_s2  ;;  %s1307_s13 = smov [#allocation11]  }
  0x87   : > { %898 = vmatpush3.msra.mxu0 %v417_v3  ;;  %933 = vmatpush3.msra.mxu1 %v510_v4  ;;  %v505_v14 = vld [vmem:[#allocation8 + $0x48] sm:$0xff]  ;;  %v504_v16 = vld [vmem:[#allocation8 + $0x40] sm:$0xff]  ;;  %v410_v17 = vld [vmem:[#allocation7 + $0x38] sm:$0xff]  ;;  %s1224_s9 = sshll.u32 %s1307_s13, 4  ;;  %s1225_s9 = int_to_ptr.vmem [resolvable:$false] %s1224_s9 }
  0x88   : > { %899 = vmatprep.subr.mxu0 %v1305_v0  ;;  %934 = vmatprep.subr.mxu1 %v1305_v0  ;;  %v503_v18 = vld [vmem:[#allocation8 + $0x38] sm:$0xff]  ;;  %v409_v19 = vld [vmem:[#allocation7 + $0x30] sm:$0xff]  ;;  %v408_v21 = vld [vmem:[#allocation7 + $0x28] sm:$0xff]  ;;  %p1222_p5 = pnand %p1221_p12, %p1682_p0  ;;  %s1226_s29 = scalar_lea.vmem %s1225_s9, 256 }
  0x89   : > { %900 = vmatpush3.msra.mxu0 %v416_v5  ;;  %935 = vmatpush3.msra.mxu1 %v509_v6  ;;  %v502_v20 = vld [vmem:[#allocation8 + $0x30] sm:$0xff]  ;;  %v501_v22 = vld [vmem:[#allocation8 + $0x28] sm:$0xff]  ;;  %v407_v23 = vld [vmem:[#allocation7 + $0x20] sm:$0xff]  ;;  %p1227_p7 = scmp.lt.s32.totalorder %s700_s14, %s1225_s9  ;;  %p1228_p9 = scmp.lt.s32.totalorder %s1226_s29, %s1220_s2 }
  0x8a   : > { %901 = vmatprep.subr.mxu0 %v1305_v0  ;;  %936 = vmatprep.subr.mxu1 %v1305_v0  ;;  %v500_v24 = vld [vmem:[#allocation8 + $0x20] sm:$0xff]  ;;  %v406_v25 = vld [vmem:[#allocation7 + $0x18] sm:$0xff]  ;;  %v405_v27 = vld [vmem:[#allocation7 + $0x10] sm:$0xff]  ;;  %p1223_p3 = pneg %p1222_p5 }
  0x8b   : > { %902 = vmatpush3.msra.mxu0 %v415_v7  ;;  %937 = vmatpush3.msra.mxu1 %v508_v8  ;;  %v499_v26 = vld [vmem:[#allocation8 + $0x18] sm:$0xff]  ;;  %v498_v28 = vld [vmem:[#allocation8 + $0x10] sm:$0xff]  ;;  %v404_v29 = vld [vmem:[#allocation7 + $0x8] sm:$0xff]  ;;  %p1229_p13 = por %p1228_p9, %p1227_p7 }
  0x8c   : > { %903 = vmatprep.subr.mxu0 %v1305_v0  ;;  %938 = vmatprep.subr.mxu1 %v1305_v0  ;;  %v497_v30 = vld [vmem:[#allocation8 + $0x8] sm:$0xff]  ;;  %v403_v31 = vld [vmem:[#allocation7] sm:$0xff]  ;;  %v606_v34 = vld [vmem:[#allocation10 + $0x78] sm:$0xff] }
  0x8d   : > { %904 = vmatpush3.msra.mxu0 %v414_v9  ;;  %939 = vmatpush3.msra.mxu1 %v507_v10  ;;  %v496_v32 = vld [vmem:[#allocation8] sm:$0xff]  ;;  %v605_v35 = vld [vmem:[#allocation10 + $0x70] sm:$0xff]  ;;  %v604_v36 = vld [vmem:[#allocation10 + $0x68] sm:$0xff]  ;;  %p1230_p8 = pnand %p1229_p13, %p1223_p3 }
  0x8e   : > { %905 = vmatprep.subr.mxu0 %v1305_v0  ;;  %940 = vmatprep.subr.mxu1 %v1305_v0  ;;  %v401_v33 = vld [vmem:[%s342_s15] sm:$0xff]  ;;  %v602_v38 = vld [vmem:[#allocation10 + $0x58] sm:$0xff]  ;;  %v601_v39 = vld [vmem:[#allocation10 + $0x50] sm:$0xff]  ;;  %s686_s15 = scalar_lea.sflag [#allocation4], %s1513_s6 }
  0x8f   : > { %906 = vmatpush3.msra.mxu0 %v413_v11  ;;  %941 = vmatpush3.msra.mxu1 %v506_v12  ;;  %v603_v37 = vld [vmem:[#allocation10 + $0x60] sm:$0xff]  ;;  %v600_v40 = vld [vmem:[#allocation10 + $0x48] sm:$0xff]  ;;  %v598_v42 = vld [vmem:[#allocation10 + $0x38] sm:$0xff] }
  0x90   : > { %907 = vmatprep.subr.mxu0 %v1305_v0  ;;  %942 = vmatprep.subr.mxu1 %v1305_v0  ;;  %v599_v41 = vld [vmem:[#allocation10 + $0x40] sm:$0xff]  ;;  %v597_v43 = vld [vmem:[#allocation10 + $0x30] sm:$0xff]  ;;  %v596_v44 = vld [vmem:[#allocation10 + $0x28] sm:$0xff] }
  0x91   : > { %908 = vmatpush3.msra.mxu0 %v412_v13  ;;  %943 = vmatpush3.msra.mxu1 %v505_v14  ;;  %v595_v45 = vld [vmem:[#allocation10 + $0x20] sm:$0xff]  ;;  %v594_v46 = vld [vmem:[#allocation10 + $0x18] sm:$0xff]  ;;  %v593_v47 = vld [vmem:[#allocation10 + $0x10] sm:$0xff] }
  0x92   : > { %909 = vmatprep.subr.mxu0 %v1305_v0  ;;  %944 = vmatprep.subr.mxu1 %v1305_v0  ;;  %v592_v48 = vld [vmem:[#allocation10 + $0x8] sm:$0xff]  ;;  %v591_v49 = vld [vmem:[#allocation10] sm:$0xff]  ;;  %v402_v52 = vld [vmem:[%s351_s19] sm:$0xff] }
  0x93   : > { %910 = vmatpush3.msra.mxu0 %v411_v15  ;;  %945 = vmatpush3.msra.mxu1 %v504_v16  ;;  %v837_v50 = vld [vmem:[%s1650_s3] ss:$0 sm:$0xff] }
  0x94   : > { %911 = vmatprep.subr.mxu0 %v1305_v0  ;;  %946 = vmatprep.subr.mxu1 %v1305_v0  ;;  %v838_v51 = vld [vmem:[%s1652_s5] ss:$0 sm:$0xff] }
  0x95   : > { %912 = vmatpush3.msra.mxu0 %v410_v17  ;;  %947 = vmatpush3.msra.mxu1 %v503_v18  ;;  %v839_v61 = vld [vmem:[%s1654_s7] ss:$0 sm:$0xff] }
  0x96   : > { %913 = vmatprep.subr.mxu0 %v1305_v0  ;;  %948 = vmatprep.subr.mxu1 %v1305_v0 }
  0x97   : > { %914 = vmatpush3.msra.mxu0 %v409_v19  ;;  %949 = vmatpush3.msra.mxu1 %v502_v20 }
  0x98   : > { %915 = vmatprep.subr.mxu0 %v1305_v0  ;;  %950 = vmatprep.subr.mxu1 %v1305_v0 }
  0x99   : > { %916 = vmatpush3.msra.mxu0 %v408_v21  ;;  %951 = vmatpush3.msra.mxu1 %v501_v22 }
  0x9a   : > { %917 = vmatprep.subr.mxu0 %v1305_v0  ;;  %952 = vmatprep.subr.mxu1 %v1305_v0 }
  0x9b   : > { %918 = vmatpush3.msra.mxu0 %v407_v23  ;;  %953 = vmatpush3.msra.mxu1 %v500_v24 }
  0x9c   : > { %919 = vmatprep.subr.mxu0 %v1305_v0  ;;  %954 = vmatprep.subr.mxu1 %v1305_v0 }
  0x9d   : > { %920 = vmatpush3.msra.mxu0 %v406_v25  ;;  %955 = vmatpush3.msra.mxu1 %v499_v26 }
  0x9e   : > { %921 = vmatprep.subr.mxu0 %v1305_v0  ;;  %956 = vmatprep.subr.mxu1 %v1305_v0 }
  0x9f   : > { %922 = vmatpush3.msra.mxu0 %v405_v27  ;;  %957 = vmatpush3.msra.mxu1 %v498_v28 }
  0xa0   : > { %923 = vmatprep.subr.mxu0 %v1305_v0  ;;  %958 = vmatprep.subr.mxu1 %v1305_v0 }
  0xa1   : > { %924 = vmatpush3.msra.mxu0 %v404_v29  ;;  %959 = vmatpush3.msra.mxu1 %v497_v30 }
  0xa2   : > { %925 = vmatprep.subr.mxu0 %v1305_v0  ;;  %960 = vmatprep.subr.mxu1 %v1305_v0 }
  0xa3   : > { %926 = vmatpush3.msra.mxu0 %v403_v31  ;;  %961 = vmatpush3.msra.mxu1 %v496_v32 }
  0xa4   : > { %928 = vmatmul.mubr.f32.vlgmr.msra.gmra.mxu0 %v401_v33  ;;  %963 = vmatmul.mubr.f32.vlgmr.msra.gmra.mxu1 %v401_v33 }
  0xa5   : > { %965 = vmatprep.subr.mxu0 %v1305_v0  ;;  %997 = vmatprep.mubr.msk.f32.mxu0 %vm1306_vm0, %v1305_v0 }
  0xa6   : > { %966 = vmatpush3.msra.mxu0 %v606_v34 }
  0xa7   : > { %967 = vmatprep.subr.mxu0 %v1305_v0 }
  0xa8   : > { %968 = vmatpush3.msra.mxu0 %v605_v35 }
  0xa9   : > { %969 = vmatprep.subr.mxu0 %v1305_v0 }
  0xaa   : > { %970 = vmatpush3.msra.mxu0 %v604_v36 }
  0xab   : > { %971 = vmatprep.subr.mxu0 %v1305_v0 }
  0xac   : > { %972 = vmatpush3.msra.mxu0 %v603_v37 }
  0xad   : > { %973 = vmatprep.subr.mxu0 %v1305_v0 }
  0xae   : > { %974 = vmatpush3.msra.mxu0 %v602_v38 }
  0xaf   : > { %975 = vmatprep.subr.mxu0 %v1305_v0 }
  0xb0   : > { %976 = vmatpush3.msra.mxu0 %v601_v39 }
  0xb1   : > { %977 = vmatprep.subr.mxu0 %v1305_v0 }
  0xb2   : > { %978 = vmatpush3.msra.mxu0 %v600_v40 }
  0xb3   : > { %979 = vmatprep.subr.mxu0 %v1305_v0 }
  0xb4   : > { %980 = vmatpush3.msra.mxu0 %v599_v41 }
  0xb5   : > { %981 = vmatprep.subr.mxu0 %v1305_v0 }
  0xb6   : > { %982 = vmatpush3.msra.mxu0 %v598_v42 }
  0xb7   : > { %983 = vmatprep.subr.mxu0 %v1305_v0 }
  0xb8   : > { %984 = vmatpush3.msra.mxu0 %v597_v43 }
  0xb9   : > { %985 = vmatprep.subr.mxu0 %v1305_v0 }
  0xba   : > { %986 = vmatpush3.msra.mxu0 %v596_v44 }
  0xbb   : > { %987 = vmatprep.subr.mxu0 %v1305_v0 }
  0xbc   : > { %988 = vmatpush3.msra.mxu0 %v595_v45 }
  0xbd   : > { %989 = vmatprep.subr.mxu0 %v1305_v0 }
  0xbe   : > { %990 = vmatpush3.msra.mxu0 %v594_v46 }
  0xbf   : > { %991 = vmatprep.subr.mxu0 %v1305_v0 }
  0xc0   : > { %992 = vmatpush3.msra.mxu0 %v593_v47 }
  0xc1   : > { %993 = vmatprep.subr.mxu0 %v1305_v0 }
  0xc2   : > { %994 = vmatpush3.msra.mxu0 %v592_v48 }
  0xc3   : > { %995 = vmatprep.subr.mxu0 %v1305_v0 }
  0xc4   : > { %996 = vmatpush3.msra.mxu0 %v591_v49 }
 0x164   : > { %v492_v53 = vpop.f32.mrf.mxu0  ;;  %v585_v54 = vpop.f32.mrf.mxu1 }
 0x165   : > { %v493_v55 = vadd.f32 %v837_v50, %v492_v53  ;;  %v586_v56 = vadd.f32 %v838_v51, %v585_v54 }
 0x166   : > { %v929_v57 = vpop.f32.mrf.mxu0  ;;  %v964_v58 = vpop.f32.mrf.mxu1 }
 0x167   : > { %v589_v59 = vmul.f32 %v493_v55, %v402_v52 }
 0x169   : > { %v590_v60 = vadd.f32 %v589_v59, %v586_v56 }
 0x16b   : > { %998 = vmatmul.mubr.f32.vlgmr.msra.gmra.mxu0 %v590_v60 }
 0x22b   : > { %v680_v62 = vpop.f32.mrf.mxu0 }
 0x22c   : > { %v681_v63 = vadd.f32 %v839_v61, %v680_v62 }
 0x22d   : > { %v999_v0 = vpop.f32.mrf.mxu0 }
 0x22e   : > { %684 = vst [vmem:[%s400_s20] sm:$0xff] %v681_v63 }
 0x22f   : > { %1233 = shalt.err (!%p1230_p8)
}
 0x230   : > { %s1234_s19 = scalar_lea.hbm %s1610_s23, 128  ;;  %s1238_s24 = scalar_lea.hbm %s1655_s8, 256 }
 0x231   : > { %p1235_p10 = scmp.ne.s32.totalorder %s1610_s23, %s1234_s19  ;;  %p1239_p2 = scmp.lt.s32.totalorder %s1610_s23, %s1655_s8 }
 0x232   : > { %p1240_p4 = scmp.lt.s32.totalorder %s1238_s24, %s1234_s19 }
 0x233   : > { %p1236_p1 = pnand %p1235_p10, %p1682_p0 }
 0x234   : > { %p1241_p6 = por %p1240_p4, %p1239_p2 }
 0x235   : > { %p1237_p11 = pneg %p1236_p1 }
 0x237   : > { %p1242_p12 = pnand %p1241_p6, %p1237_p11 }
 0x239   : > { %1245 = shalt.err (!%p1242_p12)
}
 0x23a   : > { %1016 = dma.vmem_to_hbm [thread:$0]  (%p1682_p0), %s700_s14, 128, %s1610_s23, %s686_s15  }
 0x23b PF: > { %s711_s10 = sand.u32 1, %s1284_s27   ;;  %p1683_p5 = scmp.ne.s32.totalorder %s1666_s12, 0 }
 0x23c   : > { %p1684_p3 = scmp.ge.s32.totalorder %s1296_s30, 2  ;;  %s712_s21 = scalar_lea.sflag [#allocation4], %s711_s10 }
 0x23e   : > { %p1036_p7 = pnand %p1684_p3, %p1683_p5 }
 0x240   : > { %p1037_p9 = pneg %p1036_p7 }
 0x242   : > { %1279 = dma.done.wait (%p1037_p9), %s712_s21, 128  }
 0x243   : > { %1281 = vsyncadd (%p1037_p9), %s712_s21, 4294967168  ;;  %s1685_s4 = sld [smem:[#allocation17_spill]]  ;;  %p25_p13 = scmp.ge.s32.totalorder %s1433_s18, 4  }
 0x244   : > { %s1686_s29 = sld [smem:[#allocation18_spill]]  ;;  %s1687_s27 = smov %s1288_s28 }
 0x245   : > { %s1689_s30 = smov %s1433_s18  ;;  %27 = sbr.rel (!%p25_p13) target bundleno = 12 (0xc), region = 122 }
 0x249   : > { %s1688_s28 = smov %s1685_s4 }
 0x24a   :  { %717 = vsyncpa [#allocation3], 1 }
 0x24b   :  { %719 = vsyncpa [#allocation3 + $0x1], 1 }
 0x24c   :  { %720 = vsyncpa [#allocation6], 1 }
 0x24d   :  { %722 = vsyncpa [#allocation6 + $0x1], 1 }
 0x24e   :  { %723 = vsyncpa [#allocation9], 1 }
 0x24f   :  { %724 = vsyncpa [#allocation4], 1 }
 0x250   :  { %726 = vsyncpa [#allocation4 + $0x1], 1 }

</bundles_post_ra>
